<compile_context>
chip_gen: v7x
topology: tpu7x:2x2x1
jax: 0.10.0
libtpu: 0.0.40
codegen_flags: <defaults>
</compile_context>

<pallas_src>
import functools

import jax
import jax.numpy as jnp
from jax.experimental import pallas as pl
from jax.experimental.pallas import tpu as pltpu

BN_EPS = 1e-5
NORM_EPS_SQ = 1e-24        # == (F.normalize default eps=1e-12) ** 2
LANE = 128
PROTO_TILE_TARGET = 512    # prototype lanes streamed per grid step
DEFAULT_SCOPED_VMEM = 32 << 20


def _round_up(n, m):
    return ((n + m - 1) // m) * m


# ---------------------------------------------------------------------------
# Kernel
# ---------------------------------------------------------------------------
def _head_kernel(idx_ref,      # scalar-prefetch: pattern index, shape (1,) int32 (SMEM)
                 x_ref,        # (B_p, Din_p)       mxu dtype
                 w1_ref,       # (1, Din_p, H_p)    mxu dtype  (pre-transposed)
                 gb_ref,       # (1, 2, H_p)        f32        (row 0: gamma, row 1: beta)
                 w2_ref,       # (1, H_p, Dout_p)   mxu dtype  (pre-transposed)
                 b2_ref,       # (1, 1, Dout_p)     f32
                 proto_ref,    # (1, Dout_p, tk)    mxu dtype  (pre-transposed, unit-norm rows)
                 logits_ref,   # (B_p, tk)          f32
                 z_ref,        # (B_p, Dout_p)      f32        (resident across the k axis)
                 zn_ref,       # scratch (B_p, Dout_p) mxu dtype
                 *, inv_batch):
    del idx_ref  # pattern selection is done by the BlockSpec index_maps

    @pl.when(pl.program_id(0) == 0)
    def _():
        # ---- Linear 1 (no bias: b1 is exactly cancelled by the BN mean subtraction;
        #      this also keeps zero batch-padding rows of h identically zero) ----
        h = jnp.dot(x_ref[...], w1_ref[0],
                    preferred_element_type=jnp.float32)                   # (B_p, H_p) f32

        # ---- BatchNorm1d (training-mode batch stats), folded into one scale/shift ----
        mean = jnp.sum(h, axis=0, keepdims=True) * inv_batch              # E[h]   over TRUE batch
        mean_sq = jnp.sum(h * h, axis=0, keepdims=True) * inv_batch       # E[h^2] over TRUE batch
        var = jnp.maximum(mean_sq - mean * mean, 0.0)                     # clamp cancellation
        scale = gb_ref[0, 0:1, :] * jax.lax.rsqrt(var + BN_EPS)           # gamma * rsqrt(var+eps)
        shift = gb_ref[0, 1:2, :] - mean * scale                          # beta - mean*scale

        # ---- BN + ReLU (2 elementwise passes) ----
        h = jnp.maximum(h * scale + shift, 0.0)

        # ---- Linear 2 ----
        w2 = w2_ref[0]
        z = jnp.dot(h.astype(w2.dtype), w2,
                    preferred_element_type=jnp.float32) + b2_ref[0]       # (B_p, Dout_p) f32

        # ---- F.normalize(z, dim=1); padded tail columns of z are exactly 0 ----
        sumsq = jnp.sum(z * z, axis=1, keepdims=True)
        zn = z * jax.lax.rsqrt(jnp.maximum(sumsq, NORM_EPS_SQ))

        z_ref[...] = zn                          # written once; block resident across k
        zn_ref[...] = zn.astype(zn_ref.dtype)    # MXU-dtype copy for the prototype matmuls

    # ---- Prototype logits for this prototype tile (bias-free, unit-norm rows) ----
    logits_ref[...] = jnp.dot(zn_ref[...], proto_ref[0],
                              preferred_element_type=jnp.float32).astype(logits_ref.dtype)


# ---------------------------------------------------------------------------
# Parameter construction / preparation
# ---------------------------------------------------------------------------
def init_multi_pattern_params(key, input_dim, hidden_dim, output_dim,
                              num_prototypes, num_pattern):
    """PyTorch-convention f32 parameters for every pattern (prototypes pre-normalized,
    mirroring MultiPatternHead.normalize_prototypes() at __init__)."""
    raw = []
    bound1 = 1.0 / (input_dim ** 0.5)
    bound2 = 1.0 / (hidden_dim ** 0.5)
    for pk in jax.random.split(key, num_pattern):
        k1, k2, k3, k4, k5 = jax.random.split(pk, 5)
        w1 = jax.random.uniform(k1, (hidden_dim, input_dim), jnp.float32, -bound1, bound1)
        b1 = jax.random.uniform(k2, (hidden_dim,), jnp.float32, -bound1, bound1)
        gamma = jnp.ones((hidden_dim,), jnp.float32)
        beta = jnp.zeros((hidden_dim,), jnp.float32)
        w2 = jax.random.uniform(k3, (output_dim, hidden_dim), jnp.float32, -bound2, bound2)
        b2 = jax.random.uniform(k4, (output_dim,), jnp.float32, -bound2, bound2)
        proto = jax.random.normal(k5, (num_prototypes, output_dim), jnp.float32)
        proto = proto / jnp.linalg.norm(proto, axis=1, keepdims=True)
        raw.append(dict(w1=w1, b1=b1, gamma=gamma, beta=beta, w2=w2, b2=b2, proto=proto))
    return raw


def prepare_params(raw_params, input_dim, hidden_dim, output_dim, num_prototypes,
                   mxu_dtype=jnp.bfloat16):
    """Stack per-pattern params along a leading P axis, pre-transpose matmul weights,
    zero-pad feature dims to lane multiples, pack gamma/beta, drop b1, cast MXU inputs."""
    din_p = _round_up(input_dim, LANE)
    h_p = _round_up(hidden_dim, LANE)
    dout_p = _round_up(output_dim, LANE)

    k_128 = _round_up(num_prototypes, LANE)
    if k_128 <= PROTO_TILE_TARGET:
        tk = k_p = k_128
    else:
        tk = PROTO_TILE_TARGET
        k_p = _round_up(num_prototypes, tk)

    def pad2(a, rows, cols):
        return jnp.pad(a, ((0, rows - a.shape[0]), (0, cols - a.shape[1])))

    def pad_row(a, cols):
        return jnp.pad(a, (0, cols - a.shape[0]))

    w1T, gb, w2T, b2, pT = [], [], [], [], []
    for p in raw_params:
        w1T.append(pad2(p["w1"].T, din_p, h_p))                        # (Din_p, H_p)
        gb.append(jnp.stack([pad_row(p["gamma"], h_p),
                             pad_row(p["beta"], h_p)], axis=0))        # (2, H_p)
        w2T.append(pad2(p["w2"].T, h_p, dout_p))                       # (H_p, Dout_p)
        b2.append(pad_row(p["b2"], dout_p)[None, :])                   # (1, Dout_p)
        pT.append(pad2(p["proto"].T, dout_p, k_p))                     # (Dout_p, K_p)
        # b1 intentionally dropped: cancelled by training-mode BN mean subtraction.

    stack = lambda xs: jnp.stack(xs, axis=0)
    return dict(
        w1T=stack(w1T).astype(mxu_dtype),
        gb=stack(gb),
        w2T=stack(w2T).astype(mxu_dtype),
        b2=stack(b2),
        pT=stack(pT).astype(mxu_dtype),
        dims=(input_dim, hidden_dim, output_dim, num_prototypes),
        padded=(din_p, h_p, dout_p, k_p, tk),
        mxu_dtype=mxu_dtype,
    )


def _vmem_bytes_estimate(b_p, din_p, h_p, dout_p, tk, mxu_dtype):
    it = jnp.dtype(mxu_dtype).itemsize
    dbl = 2  # auto-pipelining double-buffers every operand / output block
    b = 0
    b += dbl * b_p * din_p * it        # x
    b += dbl * din_p * h_p * it        # w1^T
    b += dbl * 2 * h_p * 4             # gamma/beta
    b += dbl * h_p * dout_p * it       # w2^T
    b += dbl * dout_p * 4              # b2
    b += dbl * dout_p * tk * it        # prototype tile
    b += dbl * b_p * tk * 4            # logits tile
    b += dbl * b_p * dout_p * 4        # z
    b += b_p * dout_p * it             # zn scratch
    b += 2 * b_p * h_p * 4             # f32 hidden intermediates headroom
    return b


# ---------------------------------------------------------------------------
# Forward wrapper
# ---------------------------------------------------------------------------
def multi_pattern_head_forward(feats, params, pattern_idx):
    """feats: (B, input_dim) f32.  Returns (logits (B, num_prototypes), z (B, output_dim))."""
    din, hdim, dout, k = params["dims"]
    din_p, h_p, dout_p, k_p, tk = params["padded"]
    mxu_dtype = params["mxu_dtype"]
    B = feats.shape[0]

    # Pad the batch to a full-sublane multiple (8 for 32-bit MXU inputs, 16 for bf16).
    # Padded rows are zero and stay exactly zero through Linear-1 (no bias), so BN
    # statistics (divided by the TRUE batch size) are unaffected; padded output rows
    # are sliced off below.
    sub = 16 if jnp.dtype(mxu_dtype).itemsize < 4 else 8
    b_p = _round_up(B, sub)

    x = jnp.pad(feats, ((0, b_p - B), (0, din_p - din))).astype(mxu_dtype)
    idx = jnp.asarray([pattern_idx], dtype=jnp.int32)

    nk = k_p // tk

    sel = lambda kk, idx_ref: (idx_ref[0], 0, 0)          # per-pattern, k-invariant
    sel_proto = lambda kk, idx_ref: (idx_ref[0], 0, kk)   # per-pattern, streamed over k
    whole = lambda kk, idx_ref: (0, 0)                    # k-invariant single tile

    grid_spec = pltpu.PrefetchScalarGridSpec(
        num_scalar_prefetch=1,
        grid=(nk,),
        in_specs=[
            pl.BlockSpec((b_p, din_p), whole),            # x
            pl.BlockSpec((1, din_p, h_p), sel),           # w1^T
            pl.BlockSpec((1, 2, h_p), sel),               # gamma/beta packed
            pl.BlockSpec((1, h_p, dout_p), sel),          # w2^T
            pl.BlockSpec((1, 1, dout_p), sel),            # b2
            pl.BlockSpec((1, dout_p, tk), sel_proto),     # prototype tile
        ],
        out_specs=[
            pl.BlockSpec((b_p, tk), lambda kk, idx_ref: (0, kk)),   # logits (lane-dense tiles)
            pl.BlockSpec((b_p, dout_p), whole),                     # z (resident across k)
        ],
        scratch_shapes=[pltpu.VMEM((b_p, dout_p), mxu_dtype)],      # zn in MXU dtype
    )

    # NOTE: the k axis must stay "arbitrary": zn is computed once at k==0 into scratch
    # and reused, which is not safe under megacore splitting of that axis.
    ckw = dict(dimension_semantics=("arbitrary",))
    est = _vmem_bytes_estimate(b_p, din_p, h_p, dout_p, tk, mxu_dtype)
    if est > DEFAULT_SCOPED_VMEM:
        # Cap at 64 MiB (v7x physical VMEM); for larger configs shrink tk / tile the batch.
        ckw["vmem_limit_bytes"] = min(int(est * 1.5) + (4 << 20), 64 << 20)
    compiler_params = pltpu.CompilerParams(**ckw)

    logits_pad, z_pad = pl.pallas_call(
        functools.partial(_head_kernel, inv_batch=1.0 / B),
        out_shape=(jax.ShapeDtypeStruct((b_p, k_p), jnp.float32),
                   jax.ShapeDtypeStruct((b_p, dout_p), jnp.float32)),
        grid_spec=grid_spec,
        compiler_params=compiler_params,
    )(idx, x, params["w1T"], params["gb"], params["w2T"], params["b2"], params["pT"])

    return logits_pad[:B, :k], z_pad[:B, :dout]


# ---------------------------------------------------------------------------
# Pure-JAX reference (keeps b1 / two-pass variance; mirrors the MXU input dtype)
# ---------------------------------------------------------------------------
def reference_forward(feats, raw_params, pattern_idx, mxu_dtype):
    p = raw_params[pattern_idx]
    hi_prec = jnp.dtype(mxu_dtype) == jnp.dtype(jnp.float32)
    prec = jax.lax.Precision.HIGHEST if hi_prec else None

    def dot(a, b):
        return jnp.dot(a.astype(mxu_dtype), b.astype(mxu_dtype),
                       preferred_element_type=jnp.float32, precision=prec)

    h = dot(feats, p["w1"].T) + p["b1"]
    mean = h.mean(axis=0, keepdims=True)
    var = ((h - mean) ** 2).mean(axis=0, keepdims=True)
    h = (h - mean) / jnp.sqrt(var + BN_EPS) * p["gamma"] + p["beta"]
    h = jnp.maximum(h, 0.0)
    z = dot(h, p["w2"].T) + p["b2"]
    zn = z * jax.lax.rsqrt(jnp.maximum(jnp.sum(z * z, axis=1, keepdims=True), NORM_EPS_SQ))
    logits = dot(zn, p["proto"].T)
    return logits, zn


# ---------------------------------------------------------------------------
if __name__ == "__main__":
    # Small shapes consistent with the module.
    B, DIN, DH, DOUT, NPROTO, NPAT = 8, 16, 32, 8, 16, 3
    PATTERN_IDX = 1

    key = jax.random.PRNGKey(0)
    kx, kp = jax.random.split(key)
    feats = jax.random.normal(kx, (B, DIN), jnp.float32)
    raw_params = init_multi_pattern_params(kp, DIN, DH, DOUT, NPROTO, NPAT)

    # Run both the exact-f32 path and the bf16-MXU-input path (perf default).
    for mxu_dtype in (jnp.float32, jnp.bfloat16):
        params = prepare_params(raw_params, DIN, DH, DOUT, NPROTO, mxu_dtype=mxu_dtype)
        logits, z = multi_pattern_head_forward(feats, params, PATTERN_IDX)
        logits, z = jax.block_until_ready((logits, z))

        ref_logits, ref_z = reference_forward(feats, raw_params, PATTERN_IDX, mxu_dtype)
        assert logits.shape == (B, NPROTO) and z.shape == (B, DOUT)
        assert jnp.allclose(logits, ref_logits, atol=2e-2, rtol=2e-2), \
            f"logits mismatch vs reference (mxu_dtype={mxu_dtype})"
        assert jnp.allclose(z, ref_z, atol=2e-2, rtol=2e-2), \
            f"z mismatch vs reference (mxu_dtype={mxu_dtype})"

    print("KERNEL_OK")
</pallas_src>

<mosaic_0001>
module attributes {stable_mosaic.version = 11 : i64} {
  func.func @_head_kernel(%arg0: i32, %arg1: memref<1xi32, #tpu.memory_space<smem>>, %arg2: memref<8x128xf32, #tpu.memory_space<vmem>>, %arg3: memref<1x128x128xf32, #tpu.memory_space<vmem>>, %arg4: memref<1x2x128xf32, #tpu.memory_space<vmem>>, %arg5: memref<1x128x128xf32, #tpu.memory_space<vmem>>, %arg6: memref<1x1x128xf32, #tpu.memory_space<vmem>>, %arg7: memref<1x128x128xf32, #tpu.memory_space<vmem>>, %arg8: memref<8x128xf32, #tpu.memory_space<vmem>>, %arg9: memref<8x128xf32, #tpu.memory_space<vmem>>, %arg10: memref<8x128xf32, #tpu.memory_space<vmem>>) attributes {dimension_semantics = [#tpu.dimension_semantics<arbitrary>], iteration_bounds = array<i64: 1>, scalar_prefetch = 1 : i64, scratch_operands = 1 : i64, tpu.core_type = #tpu.core_type<tc>, window_params = [{pipeline_mode = #tpu.pipeline_mode<synchronous>, transform_indices = @transform_0, window_bounds = array<i64: 8, 128>}, {transform_indices = @transform_1, window_bounds = array<i64: 1, 128, 128>}, {transform_indices = @transform_2, window_bounds = array<i64: 1, 2, 128>}, {transform_indices = @transform_3, window_bounds = array<i64: 1, 128, 128>}, {transform_indices = @transform_4, window_bounds = array<i64: 1, 1, 128>}, {transform_indices = @transform_5, window_bounds = array<i64: 1, 128, 128>}, {transform_indices = @transform_6, window_bounds = array<i64: 8, 128>}, {pipeline_mode = #tpu.pipeline_mode<synchronous>, transform_indices = @transform_7, window_bounds = array<i64: 8, 128>}]} {
    %c0_i32 = arith.constant 0 : i32
    %0 = arith.cmpi eq, %arg0, %c0_i32 : i32
    %1 = arith.extui %0 : i1 to i32
    %c0_i32_0 = arith.constant 0 : i32
    %2 = arith.cmpi ne, %1, %c0_i32_0 : i32
    scf.if %2 {
      %c0_7 = arith.constant 0 : index
      %c0_8 = arith.constant 0 : index
      %8 = vector.load %arg2[%c0_7, %c0_8] : memref<8x128xf32, #tpu.memory_space<vmem>>, vector<8x128xf32>
      %c0_9 = arith.constant 0 : index
      %c0_10 = arith.constant 0 : index
      %c0_11 = arith.constant 0 : index
      %9 = vector.load %arg3[%c0_9, %c0_10, %c0_11] : memref<1x128x128xf32, #tpu.memory_space<vmem>>, vector<1x128x128xf32>
      %10 = vector.shape_cast %9 : vector<1x128x128xf32> to vector<128x128xf32>
      %cst_12 = arith.constant dense<0.000000e+00> : vector<8x128xf32>
      %11 = tpu.matmul %8, %10, %cst_12 {dimension_numbers = #tpu.dot_dimension_numbers<[1], [0], [0], [1], [0, 0, 1, 1], [], []>} : vector<8x128xf32>, vector<128x128xf32>, vector<8x128xf32> -> vector<8x128xf32>
      %cst_13 = arith.constant dense<0.000000e+00> : vector<128xf32>
      %12 = vector.multi_reduction <add>, %11, %cst_13 [0] : vector<8x128xf32> to vector<128xf32>
      %13 = vector.shape_cast %12 : vector<128xf32> to vector<1x128xf32>
      %cst_14 = arith.constant 1.250000e-01 : f32
      %14 = vector.broadcast %cst_14 : f32 to vector<1x128xf32>
      %15 = arith.mulf %13, %14 : vector<1x128xf32>
      %16 = arith.mulf %11, %11 : vector<8x128xf32>
      %cst_15 = arith.constant dense<0.000000e+00> : vector<128xf32>
      %17 = vector.multi_reduction <add>, %16, %cst_15 [0] : vector<8x128xf32> to vector<128xf32>
      %18 = vector.shape_cast %17 : vector<128xf32> to vector<1x128xf32>
      %cst_16 = arith.constant 1.250000e-01 : f32
      %19 = vector.broadcast %cst_16 : f32 to vector<1x128xf32>
      %20 = arith.mulf %18, %19 : vector<1x128xf32>
      %21 = arith.mulf %15, %15 : vector<1x128xf32>
      %22 = arith.subf %20, %21 : vector<1x128xf32>
      %cst_17 = arith.constant 0.000000e+00 : f32
      %23 = vector.broadcast %cst_17 : f32 to vector<1x128xf32>
      %24 = arith.maximumf %22, %23 : vector<1x128xf32>
      %c0_18 = arith.constant 0 : index
      %c0_19 = arith.constant 0 : index
      %c0_20 = arith.constant 0 : index
      %25 = vector.load %arg4[%c0_18, %c0_19, %c0_20] : memref<1x2x128xf32, #tpu.memory_space<vmem>>, vector<1x1x128xf32>
      %26 = vector.shape_cast %25 : vector<1x1x128xf32> to vector<1x128xf32>
      %cst_21 = arith.constant 9.99999974E-6 : f32
      %27 = vector.broadcast %cst_21 : f32 to vector<1x128xf32>
      %28 = arith.addf %24, %27 : vector<1x128xf32>
      %29 = math.rsqrt %28 : vector<1x128xf32>
      %30 = arith.mulf %26, %29 : vector<1x128xf32>
      %c0_22 = arith.constant 0 : index
      %c1 = arith.constant 1 : index
      %c0_23 = arith.constant 0 : index
      %31 = vector.load %arg4[%c0_22, %c1, %c0_23] : memref<1x2x128xf32, #tpu.memory_space<vmem>>, vector<1x1x128xf32>
      %32 = vector.shape_cast %31 : vector<1x1x128xf32> to vector<1x128xf32>
      %33 = arith.mulf %15, %30 : vector<1x128xf32>
      %34 = arith.subf %32, %33 : vector<1x128xf32>
      %35 = vector.broadcast %30 : vector<1x128xf32> to vector<8x128xf32>
      %36 = arith.mulf %11, %35 : vector<8x128xf32>
      %37 = vector.broadcast %34 : vector<1x128xf32> to vector<8x128xf32>
      %38 = arith.addf %36, %37 : vector<8x128xf32>
      %cst_24 = arith.constant 0.000000e+00 : f32
      %39 = vector.broadcast %cst_24 : f32 to vector<8x128xf32>
      %40 = arith.maximumf %38, %39 : vector<8x128xf32>
      %c0_25 = arith.constant 0 : index
      %c0_26 = arith.constant 0 : index
      %c0_27 = arith.constant 0 : index
      %41 = vector.load %arg5[%c0_25, %c0_26, %c0_27] : memref<1x128x128xf32, #tpu.memory_space<vmem>>, vector<1x128x128xf32>
      %42 = vector.shape_cast %41 : vector<1x128x128xf32> to vector<128x128xf32>
      %cst_28 = arith.constant dense<0.000000e+00> : vector<8x128xf32>
      %43 = tpu.matmul %40, %42, %cst_28 {dimension_numbers = #tpu.dot_dimension_numbers<[1], [0], [0], [1], [0, 0, 1, 1], [], []>} : vector<8x128xf32>, vector<128x128xf32>, vector<8x128xf32> -> vector<8x128xf32>
      %c0_29 = arith.constant 0 : index
      %c0_30 = arith.constant 0 : index
      %c0_31 = arith.constant 0 : index
      %44 = vector.load %arg6[%c0_29, %c0_30, %c0_31] : memref<1x1x128xf32, #tpu.memory_space<vmem>>, vector<1x1x128xf32>
      %45 = vector.shape_cast %44 : vector<1x1x128xf32> to vector<1x128xf32>
      %46 = vector.broadcast %45 : vector<1x128xf32> to vector<8x128xf32>
      %47 = arith.addf %43, %46 : vector<8x128xf32>
      %48 = arith.mulf %47, %47 : vector<8x128xf32>
      %cst_32 = arith.constant dense<0.000000e+00> : vector<8xf32>
      %49 = vector.multi_reduction <add>, %48, %cst_32 [1] : vector<8x128xf32> to vector<8xf32>
      %50 = vector.shape_cast %49 : vector<8xf32> to vector<8x1xf32>
      %cst_33 = arith.constant 1.000000e-24 : f32
      %51 = vector.broadcast %cst_33 : f32 to vector<8x1xf32>
      %52 = arith.maximumf %50, %51 : vector<8x1xf32>
      %53 = math.rsqrt %52 : vector<8x1xf32>
      %54 = vector.broadcast %53 : vector<8x1xf32> to vector<8x128xf32>
      %55 = arith.mulf %47, %54 : vector<8x128xf32>
      %c0_34 = arith.constant 0 : index
      %c0_35 = arith.constant 0 : index
      %56 = vector.load %arg9[%c0_34, %c0_35] : memref<8x128xf32, #tpu.memory_space<vmem>>, vector<8x128xf32>
      tpu.vector_store %arg9[%c0_34, %c0_35], %55 {strides = array<i32>} : memref<8x128xf32, #tpu.memory_space<vmem>>, vector<8x128xf32>,
      %c0_36 = arith.constant 0 : index
      %c0_37 = arith.constant 0 : index
      %57 = vector.load %arg10[%c0_36, %c0_37] : memref<8x128xf32, #tpu.memory_space<vmem>>, vector<8x128xf32>
      tpu.vector_store %arg10[%c0_36, %c0_37], %55 {strides = array<i32>} : memref<8x128xf32, #tpu.memory_space<vmem>>, vector<8x128xf32>,
    } else {
    }
    %c0 = arith.constant 0 : index
    %c0_1 = arith.constant 0 : index
    %3 = vector.load %arg10[%c0, %c0_1] : memref<8x128xf32, #tpu.memory_space<vmem>>, vector<8x128xf32>
    %c0_2 = arith.constant 0 : index
    %c0_3 = arith.constant 0 : index
    %c0_4 = arith.constant 0 : index
    %4 = vector.load %arg7[%c0_2, %c0_3, %c0_4] : memref<1x128x128xf32, #tpu.memory_space<vmem>>, vector<1x128x128xf32>
    %5 = vector.shape_cast %4 : vector<1x128x128xf32> to vector<128x128xf32>
    %cst = arith.constant dense<0.000000e+00> : vector<8x128xf32>
    %6 = tpu.matmul %3, %5, %cst {dimension_numbers = #tpu.dot_dimension_numbers<[1], [0], [0], [1], [0, 0, 1, 1], [], []>} : vector<8x128xf32>, vector<128x128xf32>, vector<8x128xf32> -> vector<8x128xf32>
    %c0_5 = arith.constant 0 : index
    %c0_6 = arith.constant 0 : index
    %7 = vector.load %arg8[%c0_5, %c0_6] : memref<8x128xf32, #tpu.memory_space<vmem>>, vector<8x128xf32>
    tpu.vector_store %arg8[%c0_5, %c0_6], %6 {strides = array<i32>} : memref<8x128xf32, #tpu.memory_space<vmem>>, vector<8x128xf32>,
    return
  }
  func.func @transform_0(%arg0: i32, %arg1: memref<1xi32, #tpu.memory_space<smem>>) -> (i32, i32) {
    %c0_i32 = arith.constant 0 : i32
    %c0_i32_0 = arith.constant 0 : i32
    %c0_i32_1 = arith.constant 0 : i32
    return %c0_i32, %c0_i32_0 : i32, i32
  }
  func.func @transform_1(%arg0: i32, %arg1: memref<1xi32, #tpu.memory_space<smem>>) -> (i32, i32, i32) {
    %c0 = arith.constant 0 : index
    %0 = memref.load %arg1[%c0] : memref<1xi32, #tpu.memory_space<smem>>
    %c0_i32 = arith.constant 0 : i32
    %c0_i32_0 = arith.constant 0 : i32
    %c0_i32_1 = arith.constant 0 : i32
    return %0, %c0_i32, %c0_i32_0 : i32, i32, i32
  }
  func.func @transform_2(%arg0: i32, %arg1: memref<1xi32, #tpu.memory_space<smem>>) -> (i32, i32, i32) {
    %c0 = arith.constant 0 : index
    %0 = memref.load %arg1[%c0] : memref<1xi32, #tpu.memory_space<smem>>
    %c0_i32 = arith.constant 0 : i32
    %c0_i32_0 = arith.constant 0 : i32
    %c0_i32_1 = arith.constant 0 : i32
    return %0, %c0_i32, %c0_i32_0 : i32, i32, i32
  }
  func.func @transform_3(%arg0: i32, %arg1: memref<1xi32, #tpu.memory_space<smem>>) -> (i32, i32, i32) {
    %c0 = arith.constant 0 : index
    %0 = memref.load %arg1[%c0] : memref<1xi32, #tpu.memory_space<smem>>
    %c0_i32 = arith.constant 0 : i32
    %c0_i32_0 = arith.constant 0 : i32
    %c0_i32_1 = arith.constant 0 : i32
    return %0, %c0_i32, %c0_i32_0 : i32, i32, i32
  }
  func.func @transform_4(%arg0: i32, %arg1: memref<1xi32, #tpu.memory_space<smem>>) -> (i32, i32, i32) {
    %c0 = arith.constant 0 : index
    %0 = memref.load %arg1[%c0] : memref<1xi32, #tpu.memory_space<smem>>
    %c0_i32 = arith.constant 0 : i32
    %c0_i32_0 = arith.constant 0 : i32
    %c0_i32_1 = arith.constant 0 : i32
    return %0, %c0_i32, %c0_i32_0 : i32, i32, i32
  }
  func.func @transform_5(%arg0: i32, %arg1: memref<1xi32, #tpu.memory_space<smem>>) -> (i32, i32, i32) {
    %c0 = arith.constant 0 : index
    %0 = memref.load %arg1[%c0] : memref<1xi32, #tpu.memory_space<smem>>
    %c0_i32 = arith.constant 0 : i32
    %c0_i32_0 = arith.constant 0 : i32
    return %0, %c0_i32, %arg0 : i32, i32, i32
  }
  func.func @transform_6(%arg0: i32, %arg1: memref<1xi32, #tpu.memory_space<smem>>) -> (i32, i32) {
    %c0_i32 = arith.constant 0 : i32
    %c0_i32_0 = arith.constant 0 : i32
    return %c0_i32, %arg0 : i32, i32
  }
  func.func @transform_7(%arg0: i32, %arg1: memref<1xi32, #tpu.memory_space<smem>>) -> (i32, i32) {
    %c0_i32 = arith.constant 0 : i32
    %c0_i32_0 = arith.constant 0 : i32
    %c0_i32_1 = arith.constant 0 : i32
    return %c0_i32, %c0_i32_0 : i32, i32
  }
}

</mosaic_0001>

<bundles_post_ra>
// kernel: tpu_custom_call.1
= control target key start
LH: loop header
LB: loop body
LE: loop exit
PB: predicated region body
PF: predicated region fallthrough
CT: control target
= control target key end

     0   :  { %15 = vsyncpa [#allocation6], 0  ;;  %s1085_s0 = inlined_call_operand.<no memory space> [shape: s32[1], index: 0, kind: input, shape index: {}]   ;;  %s1086_s1 = inlined_call_operand.hbm [shape: f32[8,128], index: 1, kind: input, shape index: {}]   ;;  %s1087_s2 = inlined_call_operand.hbm [shape: f32[3,128,128], index: 2, kind: input, shape index: {}]   ;;  %s1088_s3 = inlined_call_operand.vmem [shape: f32[3,2,128], index: 3, kind: input, shape index: {}]   ;;  %s1089_s4 = inlined_call_operand.hbm [shape: f32[3,128,128], index: 4, kind: input, shape index: {}]   ;;  %s1090_s5 = inlined_call_operand.vmem [shape: f32[3,1,128], index: 5, kind: input, shape index: {}]   ;;  %s1091_s6 = inlined_call_operand.hbm [shape: f32[3,128,128], index: 6, kind: input, shape index: {}]   ;;  %s1092_s7 = inlined_call_operand.hbm [shape: f32[8,128], index: 7, kind: output, shape index: {0}]   ;;  %s1093_s8 = inlined_call_operand.hbm [shape: f32[8,128], index: 8, kind: output, shape index: {1}]  }
   0x1   :  { %16 = vsyncpa [#allocation9], 0 }
   0x2   :  { %17 = vsyncpa [#allocation12], 0 }
   0x3   :  { %18 = vsyncpa [#allocation7], 0  ;;  %s951_s29 = sshll.u32 %s1085_s0, 11 }
   0x4   :  { %19 = vsyncpa [#allocation15], 0  ;;  %s38_s10 = scalar_lea.hbm %s1087_s2, %s951_s29  ;;  %s892_s11 = smov [#allocation8]  }
   0x5   :  { %s39_s12 = sshll.u32 %s892_s11, 4  ;;  %s744_s13 = scalar_lea.hbm %s38_s10, 2048  ;;  %s40_s12 = int_to_ptr.vmem [resolvable:$true] %s39_s12 }
   0x6   :  { %p745_p0 = scmp.ne.s32.totalorder %s38_s10, %s744_s13  ;;  %s746_s16 = scalar_lea.hbm %s1087_s2, 6144 }
   0x7   :  { %p747_p1 = scmp.lt.u32.totalorder %s38_s10, %s1087_s2  ;;  %p748_p2 = scmp.lt.u32.totalorder %s746_s16, %s744_s13 }
   0x8   :  { %p750_p4 = scmp.lt.u32.totalorder %s744_s13, %s38_s10 }
   0x9   :  { %p749_p3 = por %p748_p2, %p747_p1 }
   0xb   :  { %p751_p5 = por %p750_p4, %p749_p3 }
   0xd   :  { %p752_p6 = pnand %p751_p5, %p745_p0 }
   0xf   :  { %755 = shalt.err (!%p752_p6)
}
  0x10   :  { %s756_s19 = scalar_lea.vmem %s40_s12, 2048  ;;  %p761_p8 = scmp.lt.s32.totalorder %s40_s12, %s40_s12 }
  0x11   :  { %p757_p7 = scmp.ne.s32.totalorder %s40_s12, %s756_s19  ;;  %p762_p9 = scmp.lt.s32.totalorder %s756_s19, %s756_s19 }
  0x13   :  { %p763_p10 = por %p762_p9, %p761_p8 }
  0x15   :  { %p764_p11 = pnand %p763_p10, %p757_p7 }
  0x17   :  { %767 = shalt.err (!%p764_p11)
}
  0x18   :  { %s893_s20 = smov 128   ;;  %s894_s21 = smov 8  }
  0x19   :  { %45 = dma.hbm_to_vmem [thread:$0]  %s38_s10, 2048, %s40_s12, [#allocation9], %s893_s20, %s893_s20, %s894_s21  }
  0x1a   :  { %s895_s2 = smov [#allocation5]   ;;  %s970_s25 = scalar_lea.hbm %s1089_s4, %s951_s29 }
  0x1b   :  { %s26_s22 = sshll.u32 %s895_s2, 4  ;;  %s768_s28 = scalar_lea.hbm %s1086_s1, 128  ;;  %s27_s22 = int_to_ptr.vmem [resolvable:$true] %s26_s22 }
  0x1c   :  { %p769_p12 = scmp.ne.s32.totalorder %s1086_s1, %s768_s28  ;;  %p772_p13 = scmp.lt.u32.totalorder %s768_s28, %s1086_s1 }
  0x1e   :  { %p774_p0 = pnand %p772_p13, %p769_p12 }
  0x20   :  { %777 = shalt.err (!%p774_p0)
}
  0x21   :  { %s778_s10 = scalar_lea.vmem %s27_s22, 128  ;;  %p783_p2 = scmp.lt.s32.totalorder %s27_s22, %s27_s22 }
  0x22   :  { %p779_p1 = scmp.ne.s32.totalorder %s27_s22, %s778_s10  ;;  %p784_p3 = scmp.lt.s32.totalorder %s778_s10, %s778_s10 }
  0x24   :  { %p785_p4 = por %p784_p3, %p783_p2 }
  0x26   :  { %p786_p5 = pnand %p785_p4, %p779_p1 }
  0x28   :  { %789 = shalt.err (!%p786_p5)
}
  0x29   :  { %29 = dma.hbm_to_vmem [thread:$0]  %s1086_s1, 128, %s27_s22, [#allocation6]  }
  0x2a   :  { %s896_s15 = smov [#allocation10]   ;;  %s988_s19 = scalar_lea.hbm %s1091_s6, %s951_s29 }
  0x2b   :  { %s63_s16 = sshll.u32 %s896_s15, 4  ;;  %s790_s2 = scalar_lea.hbm %s970_s25, 2048  ;;  %s64_s16 = int_to_ptr.vmem [resolvable:$true] %s63_s16 }
  0x2c   :  { %p791_p6 = scmp.ne.s32.totalorder %s970_s25, %s790_s2  ;;  %s792_s26 = scalar_lea.hbm %s1089_s4, 6144 }
  0x2d   :  { %p793_p7 = scmp.lt.u32.totalorder %s970_s25, %s1089_s4  ;;  %p794_p8 = scmp.lt.u32.totalorder %s792_s26, %s790_s2 }
  0x2e   :  { %p796_p10 = scmp.lt.u32.totalorder %s790_s2, %s970_s25 }
  0x2f   :  { %p795_p9 = por %p794_p8, %p793_p7 }
  0x31   :  { %p797_p11 = por %p796_p10, %p795_p9 }
  0x33   :  { %p798_p12 = pnand %p797_p11, %p791_p6 }
  0x35   :  { %801 = shalt.err (!%p798_p12)
}
  0x36   :  { %s802_s1 = scalar_lea.vmem %s64_s16, 2048  ;;  %p807_p0 = scmp.lt.s32.totalorder %s64_s16, %s64_s16 }
  0x37   :  { %p803_p13 = scmp.ne.s32.totalorder %s64_s16, %s802_s1  ;;  %p808_p1 = scmp.lt.s32.totalorder %s802_s1, %s802_s1 }
  0x39   :  { %p809_p2 = por %p808_p1, %p807_p0 }
  0x3b   :  { %p810_p3 = pnand %p809_p2, %p803_p13 }
  0x3d   :  { %813 = shalt.err (!%p810_p3)
}
  0x3e   :  { %69 = dma.hbm_to_vmem [thread:$0]  %s970_s25, 2048, %s64_s16, [#allocation9], %s893_s20, %s893_s20, %s894_s21  }
  0x3f   :  { %s897_s4 = smov [#allocation11]   ;;  %s814_s22 = scalar_lea.hbm %s988_s19, 2048 }
  0x40   :  { %s86_s29 = sshll.u32 %s897_s4, 4  ;;  %p815_p4 = scmp.ne.s32.totalorder %s988_s19, %s814_s22  ;;  %s87_s29 = int_to_ptr.vmem [resolvable:$true] %s86_s29 }
  0x41   :  { %s816_s11 = scalar_lea.hbm %s1091_s6, 6144  ;;  %p817_p5 = scmp.lt.u32.totalorder %s988_s19, %s1091_s6 }
  0x42   :  { %p818_p6 = scmp.lt.u32.totalorder %s816_s11, %s814_s22  ;;  %p820_p8 = scmp.lt.u32.totalorder %s814_s22, %s988_s19 }
  0x44   :  { %p819_p7 = por %p818_p6, %p817_p5 }
  0x46   :  { %p821_p9 = por %p820_p8, %p819_p7 }
  0x48   :  { %p822_p10 = pnand %p821_p9, %p815_p4 }
  0x4a   :  { %825 = shalt.err (!%p822_p10)
}
  0x4b   :  { %s826_s25 = scalar_lea.vmem %s87_s29, 2048  ;;  %p831_p12 = scmp.lt.s32.totalorder %s87_s29, %s87_s29 }
  0x4c   :  { %p827_p11 = scmp.ne.s32.totalorder %s87_s29, %s826_s25  ;;  %p832_p13 = scmp.lt.s32.totalorder %s826_s25, %s826_s25 }
  0x4e   :  { %p833_p0 = por %p832_p13, %p831_p12 }
  0x50   :  { %p834_p1 = pnand %p833_p0, %p827_p11 }
  0x52   :  { %837 = shalt.err (!%p834_p1)
}
  0x53   :  { %92 = dma.hbm_to_vmem [thread:$0]  %s988_s19, 2048, %s87_s29, [#allocation12], %s893_s20, %s893_s20, %s894_s21  }
  0x54   :  { %882 = dma.done.wait [#allocation6], 128  }
  0x55   :  { %883 = vsyncadd [#allocation6], 4294967168 }
  0x56   :  { %884 = dma.done.wait [#allocation9], 4096  }
  0x57   :  { %885 = vsyncadd [#allocation9], 4294963200 }
  0x58   :  { %886 = dma.done.wait [#allocation12], 2048  }
  0x59   :  { %887 = vsyncadd [#allocation12], 4294965248  ;;  %v898_v0 = vmov 0.0|0.0   ;;  %vm899_vm0 = vmmov 0   ;;  %v900_v1 = vmov 0.0   ;;  %v133_v2 = vld [vmem:[#allocation8] sm:$0xff] }
  0x5a   :  { %657 = vmatprep.subr.bf16.mxu0 %v898_v0  ;;  %584 = vmatprep.mubr.msk.f32.mxu0 %vm899_vm0, %v900_v1  ;;  %v134_v3 = vld [vmem:[#allocation8 + $0x8] sm:$0xff]  ;;  %v135_v4 = vld [vmem:[#allocation8 + $0x10] sm:$0xff]  ;;  %v136_v6 = vld [vmem:[#allocation8 + $0x18] sm:$0xff]  ;;  %p116_p2 = scmp.lt.s32.totalorder %s1085_s0, 2 }
  0x5b   :  { %681 = vmatprep.subr.bf16.mxu1 %v898_v0  ;;  %619 = vmatprep.mubr.msk.f32.mxu1 %vm899_vm0, %v900_v1  ;;  %v658_v5 = vpack.c.bf16 %v134_v3, %v133_v2  ;;  %v661_v7 = vpack.c.bf16 %v136_v6, %v135_v4  ;;  %v137_v8 = vld [vmem:[#allocation8 + $0x20] sm:$0xff]  ;;  %v138_v9 = vld [vmem:[#allocation8 + $0x28] sm:$0xff]  ;;  %v139_v11 = vld [vmem:[#allocation8 + $0x30] sm:$0xff] }
  0x5c   :  { %v664_v10 = vpack.c.bf16 %v138_v9, %v137_v8  ;;  %v140_v12 = vld [vmem:[#allocation8 + $0x38] sm:$0xff]  ;;  %v141_v14 = vld [vmem:[#allocation8 + $0x40] sm:$0xff]  ;;  %v142_v15 = vld [vmem:[#allocation8 + $0x48] sm:$0xff]  ;;  %s1095_s0 = smov (!%p116_p2, %s1085_s0), 2  ;;  %v244_v9 = vlaneseq }
  0x5d   :  { %659 = vmatpush3.bf16.msra.mxu0 %v658_v5  ;;  %v667_v13 = vpack.c.bf16 %v140_v12, %v139_v11  ;;  %v670_v16 = vpack.c.bf16 %v142_v15, %v141_v14  ;;  %v143_v17 = vld [vmem:[#allocation8 + $0x50] sm:$0xff]  ;;  %v144_v18 = vld [vmem:[#allocation8 + $0x58] sm:$0xff]  ;;  %v145_v20 = vld [vmem:[#allocation8 + $0x60] sm:$0xff]  ;;  %s496_s14 = sshll.u32 %s1095_s0, 1  ;;  %s125_s19 = scalar_lea.vmem %s1090_s5, %s1095_s0 }
  0x5e   :  { %660 = vmatprep.subr.bf16.mxu0 %v898_v0  ;;  %v673_v19 = vpack.c.bf16 %v144_v18, %v143_v17  ;;  %v146_v21 = vld [vmem:[#allocation8 + $0x68] sm:$0xff]  ;;  %v147_v23 = vld [vmem:[#allocation8 + $0x70] sm:$0xff]  ;;  %v148_v24 = vld [vmem:[#allocation8 + $0x78] sm:$0xff]  ;;  %s119_s17 = scalar_lea.vmem %s1088_s3, %s496_s14  ;;  %s901_s0 = smov [#allocation14]  }
  0x5f   :  { %v676_v22 = vpack.c.bf16 %v146_v21, %v145_v20  ;;  %v679_v25 = vpack.c.bf16 %v148_v24, %v147_v23  ;;  %v132_v26 = vld [vmem:[#allocation5] sm:$0xff]  ;;  %v255_v27 = vld [vmem:[#allocation10] sm:$0xff]  ;;  %v256_v28 = vld [vmem:[#allocation10 + $0x8] sm:$0xff]  ;;  %s460_s5 = sshll.u32 %s901_s0, 4  ;;  %s461_s5 = int_to_ptr.vmem [resolvable:$true] %s460_s5 }
  0x60   :  { %v682_v29 = vpack.c.bf16 %v256_v28, %v255_v27  ;;  %v257_v30 = vld [vmem:[#allocation10 + $0x10] sm:$0xff]  ;;  %v258_v31 = vld [vmem:[#allocation10 + $0x18] sm:$0xff]  ;;  %v259_v33 = vld [vmem:[#allocation10 + $0x20] sm:$0xff]  ;;  %s838_s2 = scalar_lea.vmem %s461_s5, 128  ;;  %p843_p4 = scmp.lt.s32.totalorder %s461_s5, %s461_s5 }
  0x61   :  { %662 = vmatpush3.bf16.msra.mxu0 %v661_v7  ;;  %v685_v32 = vpack.c.bf16 %v258_v31, %v257_v30  ;;  %v260_v34 = vld [vmem:[#allocation10 + $0x28] sm:$0xff]  ;;  %v261_v36 = vld [vmem:[#allocation10 + $0x30] sm:$0xff]  ;;  %v262_v37 = vld [vmem:[#allocation10 + $0x38] sm:$0xff]  ;;  %p839_p3 = scmp.ne.s32.totalorder %s461_s5, %s838_s2  ;;  %p844_p5 = scmp.lt.s32.totalorder %s838_s2, %s838_s2 }
  0x62   :  { %663 = vmatprep.subr.bf16.mxu0 %v898_v0  ;;  %683 = vmatpush3.bf16.msra.mxu1 %v682_v29  ;;  %v688_v35 = vpack.c.bf16 %v260_v34, %v259_v33  ;;  %v691_v38 = vpack.c.bf16 %v262_v37, %v261_v36  ;;  %v263_v39 = vld [vmem:[#allocation10 + $0x40] sm:$0xff]  ;;  %v264_v40 = vld [vmem:[#allocation10 + $0x48] sm:$0xff]  ;;  %v265_v42 = vld [vmem:[#allocation10 + $0x50] sm:$0xff] }
  0x63   :  { %684 = vmatprep.subr.bf16.mxu1 %v898_v0  ;;  %v694_v41 = vpack.c.bf16 %v264_v40, %v263_v39  ;;  %v266_v43 = vld [vmem:[#allocation10 + $0x58] sm:$0xff]  ;;  %v267_v45 = vld [vmem:[#allocation10 + $0x60] sm:$0xff]  ;;  %v268_v46 = vld [vmem:[#allocation10 + $0x68] sm:$0xff]  ;;  %p845_p6 = por %p844_p5, %p843_p4 }
  0x64   :  { %v697_v44 = vpack.c.bf16 %v266_v43, %v265_v42  ;;  %v700_v47 = vpack.c.bf16 %v268_v46, %v267_v45  ;;  %v269_v48 = vld [vmem:[#allocation10 + $0x70] sm:$0xff]  ;;  %v270_v49 = vld [vmem:[#allocation10 + $0x78] sm:$0xff]  ;;  %v357_v23 = vld [vmem:[#allocation11] sm:$0xff] }
  0x65   :  { %665 = vmatpush3.bf16.msra.mxu0 %v664_v10  ;;  %v703_v50 = vpack.c.bf16 %v270_v49, %v269_v48  ;;  %v245_v10 = vshrl.u32 %v244_v9, 7  ;;  %v237_v11 = vld [vmem:[%s119_s17] sm:$0x1]  ;;  %v241_v15 = vld [vmem:[%s119_s17 + $0x1] sm:$0x1]  ;;  %v358_v24 = vld [vmem:[#allocation11 + $0x8] sm:$0xff]  ;;  %p846_p7 = pnand %p845_p6, %p839_p3 }
  0x66   :  { %666 = vmatprep.subr.bf16.mxu0 %v898_v0  ;;  %686 = vmatpush3.bf16.msra.mxu1 %v685_v32  ;;  %v360_v27 = vld [vmem:[#allocation11 + $0x18] sm:$0xff]  ;;  %v361_v29 = vld [vmem:[#allocation11 + $0x20] sm:$0xff]  ;;  %v362_v30 = vld [vmem:[#allocation11 + $0x28] sm:$0xff] }
  0x67   :  { %687 = vmatprep.subr.bf16.mxu1 %v898_v0  ;;  %v246_v12 = vsub.s32 0, %v245_v10  ;;  %v712_v31 = vpack.c.bf16 %v362_v30, %v361_v29  ;;  %v363_v32 = vld [vmem:[#allocation11 + $0x30] sm:$0xff]  ;;  %v364_v33 = vld [vmem:[#allocation11 + $0x38] sm:$0xff]  ;;  %v365_v40 = vld [vmem:[#allocation11 + $0x40] sm:$0xff] }
  0x68   :  { %v715_v34 = vpack.c.bf16 %v364_v33, %v363_v32  ;;  %v367_v43 = vld [vmem:[#allocation11 + $0x50] sm:$0xff]  ;;  %v369_v46 = vld [vmem:[#allocation11 + $0x60] sm:$0xff] }
  0x69   :  { %668 = vmatpush3.bf16.msra.mxu0 %v667_v13  ;;  %v371_v49 = vld [vmem:[#allocation11 + $0x70] sm:$0xff] }
  0x6a   :  { %669 = vmatprep.subr.bf16.mxu0 %v898_v0  ;;  %689 = vmatpush3.bf16.msra.mxu1 %v688_v35  ;;  %v497_v35 = vld [vmem:[%s125_s19] ss:$0 sm:$0xff] }
  0x6b   :  { %690 = vmatprep.subr.bf16.mxu1 %v898_v0 }
  0x6d   :  { %671 = vmatpush3.bf16.msra.mxu0 %v670_v16 }
  0x6e   :  { %672 = vmatprep.subr.bf16.mxu0 %v898_v0  ;;  %692 = vmatpush3.bf16.msra.mxu1 %v691_v38 }
  0x6f   :  { %693 = vmatprep.subr.bf16.mxu1 %v898_v0 }
  0x71   :  { %674 = vmatpush3.bf16.msra.mxu0 %v673_v19 }
  0x72   :  { %675 = vmatprep.subr.bf16.mxu0 %v898_v0  ;;  %695 = vmatpush3.bf16.msra.mxu1 %v694_v41  ;;  %v366_v41 = vld [vmem:[#allocation11 + $0x48] sm:$0xff] }
  0x73   :  { %696 = vmatprep.subr.bf16.mxu1 %v898_v0  ;;  %v718_v42 = vpack.c.bf16 %v366_v41, %v365_v40 }
  0x75   :  { %677 = vmatpush3.bf16.msra.mxu0 %v676_v22 }
  0x76   :  { %678 = vmatprep.subr.bf16.mxu0 %v898_v0  ;;  %698 = vmatpush3.bf16.msra.mxu1 %v697_v44  ;;  %v368_v44 = vld [vmem:[#allocation11 + $0x58] sm:$0xff] }
  0x77   :  { %699 = vmatprep.subr.bf16.mxu1 %v898_v0  ;;  %v721_v45 = vpack.c.bf16 %v368_v44, %v367_v43 }
  0x79   :  { %680 = vmatpush3.bf16.msra.mxu0 %v679_v25  ;;  %v359_v25 = vld [vmem:[#allocation11 + $0x10] sm:$0xff] }
  0x7a   :  { %705 = vmatprep.subr.bf16.mxu0 %v898_v0  ;;  %701 = vmatpush3.bf16.msra.mxu1 %v700_v47  ;;  %v709_v28 = vpack.c.bf16 %v360_v27, %v359_v25  ;;  %v370_v47 = vld [vmem:[#allocation11 + $0x68] sm:$0xff] }
  0x7b   :  { %702 = vmatprep.subr.bf16.mxu1 %v898_v0  ;;  %v724_v48 = vpack.c.bf16 %v370_v47, %v369_v46 }
  0x7c   :  { %585 = vmatmul.mubr.f32.vlgmr.msra.gmra.mrb[0].mxu0 %v132_v26  ;;  %v706_v26 = vpack.c.bf16 %v358_v24, %v357_v23 }
  0x7d   :  { %654 = vmatprep.mubr.msk.f32.mxu0 %vm899_vm0, %v900_v1 }
  0x7e   :  { %704 = vmatpush3.bf16.msra.mxu1 %v703_v50  ;;  %707 = vmatpush3.bf16.msra.mxu0 %v706_v26  ;;  %v372_v50 = vld [vmem:[#allocation11 + $0x78] sm:$0xff] }
  0x7f   :  { %708 = vmatprep.subr.bf16.mxu0 %v898_v0 }
  0x82   :  { %710 = vmatpush3.bf16.msra.mxu0 %v709_v28 }
  0x83   :  { %711 = vmatprep.subr.bf16.mxu0 %v898_v0 }
  0x86   :  { %713 = vmatpush3.bf16.msra.mxu0 %v712_v31 }
  0x87   :  { %714 = vmatprep.subr.bf16.mxu0 %v898_v0 }
  0x8a   :  { %716 = vmatpush3.bf16.msra.mxu0 %v715_v34 }
  0x8b   :  { %717 = vmatprep.subr.bf16.mxu0 %v898_v0 }
  0x8e   :  { %719 = vmatpush3.bf16.msra.mxu0 %v718_v42 }
  0x8f   :  { %720 = vmatprep.subr.bf16.mxu0 %v898_v0 }
  0x92   :  { %722 = vmatpush3.bf16.msra.mxu0 %v721_v45 }
  0x93   :  { %723 = vmatprep.subr.bf16.mxu0 %v898_v0 }
  0x96   :  { %725 = vmatpush3.bf16.msra.mxu0 %v724_v48 }
  0x97   :  { %726 = vmatprep.subr.bf16.mxu0 %v898_v0 }
 0x14f   :  { %v215_v51 = vpop.f32.mrb[0].mxu0 }
 0x150   :  { %v219_v52 = vrot.slane %v215_v51, 4  ;;  %v226_v53 = vmul.f32 %v215_v51, %v215_v51  ;;  %v586_v54 = vpop.f32.mrb[1].mxu0 }
 0x152   :  { %v220_v55 = vadd.f32 %v219_v52, %v215_v51  ;;  %v227_v56 = vrot.slane %v226_v53, 4 }
 0x154   :  { %v221_v57 = vrot.slane %v220_v55, 2  ;;  %v228_v58 = vadd.f32 %v227_v56, %v226_v53 }
 0x156   :  { %v222_v59 = vadd.f32 %v221_v57, %v220_v55  ;;  %v229_v60 = vrot.slane %v228_v58, 2 }
 0x158   :  { %v223_v61 = vrot.slane %v222_v59, 1  ;;  %v230_v62 = vadd.f32 %v229_v60, %v228_v58 }
 0x15a   :  { %v224_v63 = vadd.f32 %v223_v61, %v222_v59  ;;  %v231_v1 = vrot.slane %v230_v62, 1 }
 0x15c   :  { %v225_v2 = vmul.f32 0.125, %v224_v63  ;;  %v232_v3 = vadd.f32 %v231_v1, %v230_v62 }
 0x15e   :  { %v233_v4 = vmul.f32 0.125, %v232_v3  ;;  %v234_v5 = vmul.f32 %v225_v2, %v225_v2 }
 0x160   :  { %v235_v6 = vsub.f32 %v233_v4, %v234_v5 }
 0x162   :  { %v236_v7 = vmax.f32 %v235_v6, 0.0 }
 0x164   :  { %v238_v8 = vadd.f32 1e-05, %v236_v7 }
 0x166   :  { %740 = vrsqrt.f32 %v238_v8 }
 0x170   :  { %v741_v13 = vpop.eup %740 }
 0x171   :  { %v240_v14 = vmul.f32 %v741_v13, %v237_v11 }
 0x173   :  { %v247_v16 = vrot.slane %v240_v14, %v246_v12  ;;  %v242_v17 = vmul.f32 %v240_v14, %v225_v2 }
 0x175   :  { %v243_v18 = vsub.f32 %v241_v15, %v242_v17  ;;  %v248_v19 = vmul.f32 %v247_v16, %v215_v51  ;;  %v727_v51 = vpack.c.bf16 %v372_v50, %v371_v49 }
 0x177   :  { %v252_v20 = vrot.slane %v243_v18, %v246_v12  ;;  %728 = vmatpush3.bf16.msra.mxu0 %v727_v51 }
 0x179   :  { %v253_v21 = vadd.f32 %v252_v20, %v248_v19 }
 0x17b   :  { %v254_v22 = vmax.f32 %v253_v21, 0.0 }
 0x17d   :  { %620 = vmatmul.mubr.f32.vlgmr.msra.gmra.mrb[0].mxu1 %v254_v22 }
 0x250   :  { %v344_v36 = vpop.f32.mrb[0].mxu1 }
 0x251   :  { %v345_v37 = vadd.f32 %v497_v35, %v344_v36  ;;  %v621_v38 = vpop.f32.mrb[1].mxu1 }
 0x253   :  { %v348_v39 = vmul.f32 %v345_v37, %v345_v37 }
 0x255   :  { %349 = vadd.xlane.f32.xlu0 %v348_v39 }
 0x2e2   :  { %v350_v52 = vpop.xlane.xlu0 %349 }
 0x2e3   :  { %v351_v53 = vmax.f32 %v350_v52, 1e-24 }
 0x2e5   :  { %742 = vrsqrt.f32 %v351_v53 }
 0x2ef   :  { %v743_v54 = vpop.eup %742 }
 0x2f0   :  { %v353_v55 = vmul.f32 %v743_v54, %v345_v37 }
 0x2f2   :  { %655 = vmatmul.mubr.f32.vlgmr.msra.gmra.mrb[2].mxu0 %v353_v55  ;;  %354 = vst [vmem:[#allocation14] sm:$0xff] %v353_v55 }
 0x2f3   :  { %849 = shalt.err (!%p846_p7)
}
 0x2f4   :  { %s850_s26 = scalar_lea.hbm %s1093_s8, 128 }
 0x2f5   :  { %p851_p8 = scmp.ne.s32.totalorder %s1093_s8, %s850_s26  ;;  %p854_p9 = scmp.lt.u32.totalorder %s850_s26, %s1093_s8 }
 0x2f7   :  { %p856_p10 = pnand %p854_p9, %p851_p8 }
 0x2f9   :  { %859 = shalt.err (!%p856_p10)
}
 0x2fa   :  { %463 = dma.vmem_to_hbm [thread:$0]  %s461_s5, 128, %s1093_s8, [#allocation15]  }
 0x2fb   :  { %s902_s30 = smov [#allocation13]  }
 0x2fc   :  { %s450_s9 = sshll.u32 %s902_s30, 4  ;;  %s451_s9 = int_to_ptr.vmem [resolvable:$true] %s450_s9 }
 0x2fd   :  { %s860_s11 = scalar_lea.vmem %s451_s9, 128  ;;  %p865_p12 = scmp.lt.s32.totalorder %s451_s9, %s451_s9 }
 0x2fe   :  { %p861_p11 = scmp.ne.s32.totalorder %s451_s9, %s860_s11  ;;  %p866_p13 = scmp.lt.s32.totalorder %s860_s11, %s860_s11 }
 0x300   :  { %p867_p0 = por %p866_p13, %p865_p12 }
 0x302   :  { %p868_p1 = pnand %p867_p0, %p861_p11 }
 0x3c5   :  { %v439_v0 = vpop.f32.mrb[2].mxu0 }
 0x3c6   :  { %443 = vst [vmem:[#allocation13] sm:$0xff] %v439_v0  ;;  %v656_v56 = vpop.f32.mrb[3].mxu0 }
 0x3c7   :  { %871 = shalt.err (!%p868_p1)
}
 0x3c8   :  { %s872_s25 = scalar_lea.hbm %s1092_s7, 128 }
 0x3c9   :  { %p873_p2 = scmp.ne.s32.totalorder %s1092_s7, %s872_s25  ;;  %p876_p3 = scmp.lt.u32.totalorder %s872_s25, %s1092_s7 }
 0x3cb   :  { %p878_p4 = pnand %p876_p3, %p873_p2 }
 0x3cd   :  { %881 = shalt.err (!%p878_p4)
}
 0x3ce   :  { %453 = dma.vmem_to_hbm [thread:$0]  %s451_s9, 128, %s1092_s7, [#allocation7]  }
 0x3cf   :  { %888 = dma.done.wait [#allocation7], 128  }
 0x3d0   :  { %889 = vsyncadd [#allocation7], 4294967168 }
 0x3d1   :  { %890 = dma.done.wait [#allocation15], 128  }
 0x3d2   :  { %891 = vsyncadd [#allocation15], 4294967168 }
 0x3d3   :  { %470 = vsyncpa [#allocation6], 1 }
 0x3d4   :  { %471 = vsyncpa [#allocation9], 1 }
 0x3d5   :  { %472 = vsyncpa [#allocation12], 1 }
 0x3d6   :  { %473 = vsyncpa [#allocation7], 1 }
 0x3d7   :  { %474 = vsyncpa [#allocation15], 1 }

</bundles_post_ra>
